<compile_context>
chip_gen: v7x
topology: tpu7x:2x2x1
jax: 0.10.0
libtpu: 0.0.40
codegen_flags: <defaults>
</compile_context>

<pallas_src>
import numpy as np
import jax
import jax.numpy as jnp
from jax import lax
from jax.experimental import pallas as pl
from jax.experimental.pallas import tpu as pltpu

# Circuit hyper-parameters (PyTorch module defaults).
N_QUBITS = 4
Q_DEPTH = 1
Q_DELTA = 0.01
DIM = 2 ** N_QUBITS  # 16 statevector amplitudes
_INV_SQRT2 = float(1.0 / np.sqrt(2.0))


# ---------------------------------------------------------------------------
# Static circuit structure helpers (PennyLane convention: wire 0 = MSB).
# ---------------------------------------------------------------------------
def _bit(b, w):
    return (b >> (N_QUBITS - 1 - w)) & 1


def _flip(b, w):
    return b ^ (1 << (N_QUBITS - 1 - w))


def _cnot_ladder_matrix():
    """(16,16) permutation M such that state' = M @ state applies
    CNOT(0,1), CNOT(2,3), CNOT(1,2) in circuit order (column-vector convention)."""
    gates = [(i, i + 1) for i in range(0, N_QUBITS - 1, 2)] + \
            [(i, i + 1) for i in range(1, N_QUBITS - 1, 2)]
    m = np.zeros((DIM, DIM), np.float32)
    for b in range(DIM):
        idx = b
        for (c, t) in gates:
            if _bit(idx, c) == 1:
                idx = _flip(idx, t)
        m[idx, b] = 1.0
    return m


_CNOT_LADDER = _cnot_ladder_matrix()


def _compose_weight_matrix(q_params):
    """Compose all batch-independent layers (per depth: CNOT ladder then RY(q_weights))
    into one (16,16) matrix.  Built with jnp so it remains differentiable in q_params."""
    qw = jnp.reshape(q_params.astype(jnp.float32), (Q_DEPTH, N_QUBITS))
    eye2 = jnp.eye(2, dtype=jnp.float32)
    cnot = jnp.asarray(_CNOT_LADDER)
    total = jnp.eye(DIM, dtype=jnp.float32)
    for k in range(Q_DEPTH):
        layer = cnot
        for w in range(N_QUBITS):
            half = qw[k, w] * 0.5
            c, s = jnp.cos(half), jnp.sin(half)
            ry2 = jnp.stack([jnp.stack([c, -s]), jnp.stack([s, c])])
            op = jnp.ones((1, 1), jnp.float32)
            for ww in range(N_QUBITS):
                op = jnp.kron(op, ry2 if ww == w else eye2)
            layer = op @ layer          # RY gates on distinct wires commute
        total = layer @ total
    return total


# ---------------------------------------------------------------------------
# Pallas kernel: one batch tile, batch on lanes.
#   x_ref:   (N_QUBITS, bt)  raw inputs (batch on lanes)
#   w_ref:   (DIM, DIM)      precomposed weight-layer matrix
#   out_ref: (N_QUBITS, bt)  PauliZ expectations (batch on lanes)
# ---------------------------------------------------------------------------
def quantum_layer_kernel(x_ref, w_ref, out_ref):
    bt = x_ref.shape[1]

    # Half data-encoding angles: (tanh(x) * pi/2) / 2   -> EUP work, lane-dense.
    half = jnp.tanh(x_ref[...].astype(jnp.float32)) * (jnp.pi * 0.25)   # (4, bt)
    c = jnp.cos(half)
    s = jnp.sin(half)
    a0 = (c - s) * _INV_SQRT2    # amplitude of |0> per wire, per row   (4, bt)
    a1 = (c + s) * _INV_SQRT2    # amplitude of |1> per wire, per row   (4, bt)

    # Product-state construction: amp[b] = prod_w a_w(bit_w(b)).
    b_idx = lax.broadcasted_iota(jnp.int32, (DIM, bt), 0)               # basis index on sublanes
    bits = []
    state = None
    for w in range(N_QUBITS):
        bit = ((b_idx >> (N_QUBITS - 1 - w)) & 1).astype(jnp.float32)   # (16, bt)
        bits.append(bit)
        a0w = a0[w:w + 1, :]
        a1w = a1[w:w + 1, :]
        factor = a0w + bit * (a1w - a0w)                                # a_w(bit_w(b))
        state = factor if state is None else state * factor             # (16, bt)

    # Apply the single precomposed (16,16) weight-layer matrix (CNOTs + RY(q_weights)).
    state = jnp.dot(w_ref[...], state, preferred_element_type=jnp.float32)

    # <Z_w> = sum_b |amp_b|^2 * (+1 if bit_w(b)==0 else -1): signed sublane reductions.
    probs = state * state
    w_idx = lax.broadcasted_iota(jnp.int32, (N_QUBITS, bt), 0)
    out = jnp.zeros((N_QUBITS, bt), jnp.float32)
    for w in range(N_QUBITS):
        sign = 1.0 - 2.0 * bits[w]
        row = jnp.sum(probs * sign, axis=0, keepdims=True)              # (1, bt)
        out = jnp.where(w_idx == w, jnp.broadcast_to(row, (N_QUBITS, bt)), out)
    out_ref[...] = out                                                  # single full-block store


# ---------------------------------------------------------------------------
# Wrapper
# ---------------------------------------------------------------------------
def _pick_block(batch, block_b):
    # Lane tiles must be a multiple of 128; cap near batch/2 so large batches keep
    # >= 2 parallel grid steps (both v7x TensorCores busy).
    half_aligned = (((max(batch, 2) + 1) // 2) + 127) // 128 * 128
    return int(max(128, min(block_b, half_aligned)))


def quantum_layer_forward(x, q_params, block_b=512):
    b, nq = x.shape
    assert nq == N_QUBITS
    bb = _pick_block(b, block_b)
    grid = pl.cdiv(b, bb)
    padded_b = grid * bb

    # Batch on lanes; pad any batch size (padded rows are sliced off afterwards).
    xt = jnp.transpose(x.astype(jnp.float32))            # (4, b)
    if padded_b != b:
        xt = jnp.pad(xt, ((0, 0), (0, padded_b - b)))
    w_mat = _compose_weight_matrix(q_params)              # (16, 16), differentiable

    out_t = pl.pallas_call(
        quantum_layer_kernel,
        out_shape=jax.ShapeDtypeStruct((N_QUBITS, padded_b), jnp.float32),
        grid=(grid,),
        in_specs=[
            pl.BlockSpec((N_QUBITS, bb), lambda i: (0, i)),   # x tile (batch on lanes)
            pl.BlockSpec((DIM, DIM), lambda i: (0, 0)),       # precomposed weight matrix
        ],
        out_specs=pl.BlockSpec((N_QUBITS, bb), lambda i: (0, i)),
        compiler_params=pltpu.CompilerParams(dimension_semantics=("parallel",)),
    )(xt, w_mat)

    return jnp.transpose(out_t)[:b]


# ---------------------------------------------------------------------------
# Independent numpy reference (kron-built dense gates), mirrors quantum_net().
# ---------------------------------------------------------------------------
def _reference_forward(x_np, q_params_np):
    I2 = np.eye(2)
    H = np.array([[1.0, 1.0], [1.0, -1.0]]) / np.sqrt(2.0)
    CNOT = np.array([[1, 0, 0, 0], [0, 1, 0, 0], [0, 0, 0, 1], [0, 0, 1, 0]], float)

    def ry(t):
        c, s = np.cos(t / 2.0), np.sin(t / 2.0)
        return np.array([[c, -s], [s, c]])

    def op1(U, wire):
        M = np.array([[1.0]])
        for w in range(N_QUBITS):
            M = np.kron(M, U if w == wire else I2)
        return M

    def op2_adj(U4, wire):  # two-qubit gate on adjacent wires (wire, wire+1)
        M = np.array([[1.0]])
        w = 0
        while w < N_QUBITS:
            if w == wire:
                M = np.kron(M, U4)
                w += 2
            else:
                M = np.kron(M, I2)
                w += 1
        return M

    q_in = np.tanh(x_np) * np.pi / 2.0
    qw = q_params_np.reshape(Q_DEPTH, N_QUBITS)
    outs = []
    for elem in q_in:
        state = np.zeros(DIM)
        state[0] = 1.0
        for w in range(N_QUBITS):
            state = op1(H, w) @ state
        for w in range(N_QUBITS):
            state = op1(ry(elem[w]), w) @ state
        for k in range(Q_DEPTH):
            for i in range(0, N_QUBITS - 1, 2):
                state = op2_adj(CNOT, i) @ state
            for i in range(1, N_QUBITS - 1, 2):
                state = op2_adj(CNOT, i) @ state
            for w in range(N_QUBITS):
                state = op1(ry(qw[k, w]), w) @ state
        row = []
        for w in range(N_QUBITS):
            diag = np.array([1.0 - 2.0 * _bit(b, w) for b in range(DIM)])
            row.append(np.sum(state ** 2 * diag))
        outs.append(row)
    return np.array(outs, np.float32)


if __name__ == "__main__":
    key = jax.random.PRNGKey(0)
    kx, kp = jax.random.split(key)
    batch = 16
    x = jax.random.normal(kx, (batch, N_QUBITS), dtype=jnp.float32)
    # Deterministic parameter init, matching q_delta * randn(q_depth * n_qubits).
    q_params = Q_DELTA * jax.random.normal(kp, (Q_DEPTH * N_QUBITS,), dtype=jnp.float32)

    out = quantum_layer_forward(x, q_params)
    out = jax.block_until_ready(out)

    ref = _reference_forward(np.asarray(x), np.asarray(q_params))
    if out.shape != (batch, N_QUBITS):
        raise AssertionError(f"bad output shape {out.shape}")
    if not np.allclose(np.asarray(out), ref, atol=1e-4, rtol=1e-4):
        raise AssertionError("Pallas QuantumLayer kernel does not match reference")
    print("KERNEL_OK")
</pallas_src>

<mosaic_0001>
module attributes {stable_mosaic.version = 11 : i64} {
  func.func @quantum_layer_kernel(%arg0: i32, %arg1: memref<4x128xf32, #tpu.memory_space<vmem>>, %arg2: memref<16x16xf32, #tpu.memory_space<vmem>>, %arg3: memref<4x128xf32, #tpu.memory_space<vmem>>) attributes {dimension_semantics = [#tpu.dimension_semantics<parallel>], iteration_bounds = array<i64: 1>, scalar_prefetch = 0 : i64, scratch_operands = 0 : i64, tpu.core_type = #tpu.core_type<tc>, window_params = [{transform_indices = @transform_0, window_bounds = array<i64: 4, 128>}, {pipeline_mode = #tpu.pipeline_mode<synchronous>, transform_indices = @transform_1, window_bounds = array<i64: 16, 16>}, {transform_indices = @transform_2, window_bounds = array<i64: 4, 128>}]} {
    %c0 = arith.constant 0 : index
    %c0_0 = arith.constant 0 : index
    %0 = vector.load %arg1[%c0, %c0_0] : memref<4x128xf32, #tpu.memory_space<vmem>>, vector<4x128xf32>
    %1 = math.tanh %0 : vector<4x128xf32>
    %cst = arith.constant 0.785398185 : f32
    %2 = vector.broadcast %cst : f32 to vector<4x128xf32>
    %3 = arith.mulf %1, %2 : vector<4x128xf32>
    %4 = math.cos %3 : vector<4x128xf32>
    %5 = math.sin %3 : vector<4x128xf32>
    %6 = arith.subf %4, %5 : vector<4x128xf32>
    %cst_1 = arith.constant 0.707106769 : f32
    %7 = vector.broadcast %cst_1 : f32 to vector<4x128xf32>
    %8 = arith.mulf %6, %7 : vector<4x128xf32>
    %9 = arith.addf %4, %5 : vector<4x128xf32>
    %cst_2 = arith.constant 0.707106769 : f32
    %10 = vector.broadcast %cst_2 : f32 to vector<4x128xf32>
    %11 = arith.mulf %9, %10 : vector<4x128xf32>
    %12 = tpu.iota {dimensions = array<i32: 0>} : vector<16x128xi32>
    %c3_i32 = arith.constant 3 : i32
    %13 = vector.broadcast %c3_i32 : i32 to vector<16x128xi32>
    %14 = arith.shrsi %12, %13 : vector<16x128xi32>
    %c1_i32 = arith.constant 1 : i32
    %15 = vector.broadcast %c1_i32 : i32 to vector<16x128xi32>
    %16 = arith.andi %14, %15 : vector<16x128xi32>
    %17 = arith.sitofp %16 : vector<16x128xi32> to vector<16x128xf32>
    %18 = vector.extract_strided_slice %8 {offsets = [0, 0], sizes = [1, 128], strides = [1, 1]} : vector<4x128xf32> to vector<1x128xf32>
    %19 = vector.extract_strided_slice %11 {offsets = [0, 0], sizes = [1, 128], strides = [1, 1]} : vector<4x128xf32> to vector<1x128xf32>
    %20 = arith.subf %19, %18 : vector<1x128xf32>
    %21 = vector.broadcast %20 : vector<1x128xf32> to vector<16x128xf32>
    %22 = arith.mulf %17, %21 : vector<16x128xf32>
    %23 = vector.broadcast %18 : vector<1x128xf32> to vector<16x128xf32>
    %24 = arith.addf %23, %22 : vector<16x128xf32>
    %c2_i32 = arith.constant 2 : i32
    %25 = vector.broadcast %c2_i32 : i32 to vector<16x128xi32>
    %26 = arith.shrsi %12, %25 : vector<16x128xi32>
    %c1_i32_3 = arith.constant 1 : i32
    %27 = vector.broadcast %c1_i32_3 : i32 to vector<16x128xi32>
    %28 = arith.andi %26, %27 : vector<16x128xi32>
    %29 = arith.sitofp %28 : vector<16x128xi32> to vector<16x128xf32>
    %30 = vector.extract_strided_slice %8 {offsets = [1, 0], sizes = [1, 128], strides = [1, 1]} : vector<4x128xf32> to vector<1x128xf32>
    %31 = vector.extract_strided_slice %11 {offsets = [1, 0], sizes = [1, 128], strides = [1, 1]} : vector<4x128xf32> to vector<1x128xf32>
    %32 = arith.subf %31, %30 : vector<1x128xf32>
    %33 = vector.broadcast %32 : vector<1x128xf32> to vector<16x128xf32>
    %34 = arith.mulf %29, %33 : vector<16x128xf32>
    %35 = vector.broadcast %30 : vector<1x128xf32> to vector<16x128xf32>
    %36 = arith.addf %35, %34 : vector<16x128xf32>
    %37 = arith.mulf %24, %36 : vector<16x128xf32>
    %c1_i32_4 = arith.constant 1 : i32
    %38 = vector.broadcast %c1_i32_4 : i32 to vector<16x128xi32>
    %39 = arith.shrsi %12, %38 : vector<16x128xi32>
    %c1_i32_5 = arith.constant 1 : i32
    %40 = vector.broadcast %c1_i32_5 : i32 to vector<16x128xi32>
    %41 = arith.andi %39, %40 : vector<16x128xi32>
    %42 = arith.sitofp %41 : vector<16x128xi32> to vector<16x128xf32>
    %43 = vector.extract_strided_slice %8 {offsets = [2, 0], sizes = [1, 128], strides = [1, 1]} : vector<4x128xf32> to vector<1x128xf32>
    %44 = vector.extract_strided_slice %11 {offsets = [2, 0], sizes = [1, 128], strides = [1, 1]} : vector<4x128xf32> to vector<1x128xf32>
    %45 = arith.subf %44, %43 : vector<1x128xf32>
    %46 = vector.broadcast %45 : vector<1x128xf32> to vector<16x128xf32>
    %47 = arith.mulf %42, %46 : vector<16x128xf32>
    %48 = vector.broadcast %43 : vector<1x128xf32> to vector<16x128xf32>
    %49 = arith.addf %48, %47 : vector<16x128xf32>
    %50 = arith.mulf %37, %49 : vector<16x128xf32>
    %c0_i32 = arith.constant 0 : i32
    %51 = vector.broadcast %c0_i32 : i32 to vector<16x128xi32>
    %52 = arith.shrsi %12, %51 : vector<16x128xi32>
    %c1_i32_6 = arith.constant 1 : i32
    %53 = vector.broadcast %c1_i32_6 : i32 to vector<16x128xi32>
    %54 = arith.andi %52, %53 : vector<16x128xi32>
    %55 = arith.sitofp %54 : vector<16x128xi32> to vector<16x128xf32>
    %56 = vector.extract_strided_slice %8 {offsets = [3, 0], sizes = [1, 128], strides = [1, 1]} : vector<4x128xf32> to vector<1x128xf32>
    %57 = vector.extract_strided_slice %11 {offsets = [3, 0], sizes = [1, 128], strides = [1, 1]} : vector<4x128xf32> to vector<1x128xf32>
    %58 = arith.subf %57, %56 : vector<1x128xf32>
    %59 = vector.broadcast %58 : vector<1x128xf32> to vector<16x128xf32>
    %60 = arith.mulf %55, %59 : vector<16x128xf32>
    %61 = vector.broadcast %56 : vector<1x128xf32> to vector<16x128xf32>
    %62 = arith.addf %61, %60 : vector<16x128xf32>
    %63 = arith.mulf %50, %62 : vector<16x128xf32>
    %c0_7 = arith.constant 0 : index
    %c0_8 = arith.constant 0 : index
    %64 = vector.load %arg2[%c0_7, %c0_8] : memref<16x16xf32, #tpu.memory_space<vmem>>, vector<16x16xf32>
    %cst_9 = arith.constant dense<0.000000e+00> : vector<16x128xf32>
    %65 = tpu.matmul %64, %63, %cst_9 {dimension_numbers = #tpu.dot_dimension_numbers<[1], [0], [0], [1], [0, 0, 1, 1], [], []>} : vector<16x16xf32>, vector<16x128xf32>, vector<16x128xf32> -> vector<16x128xf32>
    %66 = arith.mulf %65, %65 : vector<16x128xf32>
    %67 = tpu.iota {dimensions = array<i32: 0>} : vector<4x128xi32>
    %cst_10 = arith.constant 0.000000e+00 : f32
    %68 = vector.broadcast %cst_10 : f32 to vector<4x128xf32>
    %cst_11 = arith.constant 2.000000e+00 : f32
    %69 = vector.broadcast %cst_11 : f32 to vector<16x128xf32>
    %70 = arith.mulf %69, %17 : vector<16x128xf32>
    %cst_12 = arith.constant 1.000000e+00 : f32
    %71 = vector.broadcast %cst_12 : f32 to vector<16x128xf32>
    %72 = arith.subf %71, %70 : vector<16x128xf32>
    %73 = arith.mulf %66, %72 : vector<16x128xf32>
    %cst_13 = arith.constant dense<0.000000e+00> : vector<128xf32>
    %74 = vector.multi_reduction <add>, %73, %cst_13 [0] : vector<16x128xf32> to vector<128xf32>
    %75 = vector.shape_cast %74 : vector<128xf32> to vector<1x128xf32>
    %c0_i32_14 = arith.constant 0 : i32
    %76 = vector.broadcast %c0_i32_14 : i32 to vector<4x128xi32>
    %77 = arith.cmpi eq, %67, %76 : vector<4x128xi32>
    %78 = vector.shape_cast %75 : vector<1x128xf32> to vector<1x128xf32>
    %79 = vector.broadcast %78 : vector<1x128xf32> to vector<4x128xf32>
    %80 = arith.select %77, %79, %68 : vector<4x128xi1>, vector<4x128xf32>
    %cst_15 = arith.constant 2.000000e+00 : f32
    %81 = vector.broadcast %cst_15 : f32 to vector<16x128xf32>
    %82 = arith.mulf %81, %29 : vector<16x128xf32>
    %cst_16 = arith.constant 1.000000e+00 : f32
    %83 = vector.broadcast %cst_16 : f32 to vector<16x128xf32>
    %84 = arith.subf %83, %82 : vector<16x128xf32>
    %85 = arith.mulf %66, %84 : vector<16x128xf32>
    %cst_17 = arith.constant dense<0.000000e+00> : vector<128xf32>
    %86 = vector.multi_reduction <add>, %85, %cst_17 [0] : vector<16x128xf32> to vector<128xf32>
    %87 = vector.shape_cast %86 : vector<128xf32> to vector<1x128xf32>
    %c1_i32_18 = arith.constant 1 : i32
    %88 = vector.broadcast %c1_i32_18 : i32 to vector<4x128xi32>
    %89 = arith.cmpi eq, %67, %88 : vector<4x128xi32>
    %90 = vector.shape_cast %87 : vector<1x128xf32> to vector<1x128xf32>
    %91 = vector.broadcast %90 : vector<1x128xf32> to vector<4x128xf32>
    %92 = arith.select %89, %91, %80 : vector<4x128xi1>, vector<4x128xf32>
    %cst_19 = arith.constant 2.000000e+00 : f32
    %93 = vector.broadcast %cst_19 : f32 to vector<16x128xf32>
    %94 = arith.mulf %93, %42 : vector<16x128xf32>
    %cst_20 = arith.constant 1.000000e+00 : f32
    %95 = vector.broadcast %cst_20 : f32 to vector<16x128xf32>
    %96 = arith.subf %95, %94 : vector<16x128xf32>
    %97 = arith.mulf %66, %96 : vector<16x128xf32>
    %cst_21 = arith.constant dense<0.000000e+00> : vector<128xf32>
    %98 = vector.multi_reduction <add>, %97, %cst_21 [0] : vector<16x128xf32> to vector<128xf32>
    %99 = vector.shape_cast %98 : vector<128xf32> to vector<1x128xf32>
    %c2_i32_22 = arith.constant 2 : i32
    %100 = vector.broadcast %c2_i32_22 : i32 to vector<4x128xi32>
    %101 = arith.cmpi eq, %67, %100 : vector<4x128xi32>
    %102 = vector.shape_cast %99 : vector<1x128xf32> to vector<1x128xf32>
    %103 = vector.broadcast %102 : vector<1x128xf32> to vector<4x128xf32>
    %104 = arith.select %101, %103, %92 : vector<4x128xi1>, vector<4x128xf32>
    %cst_23 = arith.constant 2.000000e+00 : f32
    %105 = vector.broadcast %cst_23 : f32 to vector<16x128xf32>
    %106 = arith.mulf %105, %55 : vector<16x128xf32>
    %cst_24 = arith.constant 1.000000e+00 : f32
    %107 = vector.broadcast %cst_24 : f32 to vector<16x128xf32>
    %108 = arith.subf %107, %106 : vector<16x128xf32>
    %109 = arith.mulf %66, %108 : vector<16x128xf32>
    %cst_25 = arith.constant dense<0.000000e+00> : vector<128xf32>
    %110 = vector.multi_reduction <add>, %109, %cst_25 [0] : vector<16x128xf32> to vector<128xf32>
    %111 = vector.shape_cast %110 : vector<128xf32> to vector<1x128xf32>
    %c3_i32_26 = arith.constant 3 : i32
    %112 = vector.broadcast %c3_i32_26 : i32 to vector<4x128xi32>
    %113 = arith.cmpi eq, %67, %112 : vector<4x128xi32>
    %114 = vector.shape_cast %111 : vector<1x128xf32> to vector<1x128xf32>
    %115 = vector.broadcast %114 : vector<1x128xf32> to vector<4x128xf32>
    %116 = arith.select %113, %115, %104 : vector<4x128xi1>, vector<4x128xf32>
    %c0_27 = arith.constant 0 : index
    %c0_28 = arith.constant 0 : index
    %117 = vector.load %arg3[%c0_27, %c0_28] : memref<4x128xf32, #tpu.memory_space<vmem>>, vector<4x128xf32>
    tpu.vector_store %arg3[%c0_27, %c0_28], %116 {strides = array<i32>} : memref<4x128xf32, #tpu.memory_space<vmem>>, vector<4x128xf32>,
    return
  }
  func.func @transform_0(%arg0: i32) -> (i32, i32) {
    %c0_i32 = arith.constant 0 : i32
    %c0_i32_0 = arith.constant 0 : i32
    return %c0_i32, %arg0 : i32, i32
  }
  func.func @transform_1(%arg0: i32) -> (i32, i32) {
    %c0_i32 = arith.constant 0 : i32
    %c0_i32_0 = arith.constant 0 : i32
    %c0_i32_1 = arith.constant 0 : i32
    return %c0_i32, %c0_i32_0 : i32, i32
  }
  func.func @transform_2(%arg0: i32) -> (i32, i32) {
    %c0_i32 = arith.constant 0 : i32
    %c0_i32_0 = arith.constant 0 : i32
    return %c0_i32, %arg0 : i32, i32
  }
}

</mosaic_0001>

<bundles_post_ra>
// kernel: tpu_custom_call.1
= control target key start
LH: loop header
LB: loop body
LE: loop exit
PB: predicated region body
PF: predicated region fallthrough
CT: control target
= control target key end

     0   :  { %7 = vsyncpa [#allocation3], 0  ;;  %s729_s0 = inlined_call_operand.hbm [shape: f32[4,128], index: 0, kind: input, shape index: {}]   ;;  %s730_s1 = inlined_call_operand.hbm [shape: f32[16,16], index: 1, kind: input, shape index: {}]   ;;  %s731_s2 = inlined_call_operand.hbm [shape: f32[4,128], index: 2, kind: output, shape index: {}]  }
   0x1   :  { %8 = vsyncpa [#allocation6], 0 }
   0x2   :  { %9 = vsyncpa [#allocation4], 0  ;;  %s613_s9 = smov [#allocation2]   ;;  %s614_s11 = smov [#allocation5]  }
   0x3   :  { %s16_s10 = sshll.u32 %s613_s9, 4  ;;  %s25_s12 = sshll.u32 %s614_s11, 4  ;;  %s17_s10 = int_to_ptr.vmem [resolvable:$true] %s16_s10  ;;  %s639_s12 = int_to_ptr.vmem [resolvable:$true] %s25_s12 }
   0x4   :  { %s541_s15 = scalar_lea.hbm %s729_s0, 64 }
   0x5   :  { %p542_p0 = scmp.ne.s32.totalorder %s729_s0, %s541_s15  ;;  %p545_p1 = scmp.lt.u32.totalorder %s541_s15, %s729_s0 }
   0x7   :  { %p547_p2 = pnand %p545_p1, %p542_p0 }
   0x9   :  { %550 = shalt.err (!%p547_p2)
}
   0xa   :  { %s551_s20 = scalar_lea.vmem %s17_s10, 64  ;;  %p556_p4 = scmp.lt.s32.totalorder %s17_s10, %s17_s10 }
   0xb   :  { %p552_p3 = scmp.ne.s32.totalorder %s17_s10, %s551_s20  ;;  %p557_p5 = scmp.lt.s32.totalorder %s551_s20, %s551_s20 }
   0xd   :  { %p558_p6 = por %p557_p5, %p556_p4 }
   0xf   :  { %p559_p7 = pnand %p558_p6, %p552_p3 }
  0x11   :  { %562 = shalt.err (!%p559_p7)
}
  0x12   :  { %19 = dma.hbm_to_vmem [thread:$0]  %s729_s0, 64, %s17_s10, [#allocation3]  }
  0x13   :  { %s563_s25 = scalar_lea.hbm %s730_s1, 256 }
  0x14   :  { %p564_p8 = scmp.ne.s32.totalorder %s730_s1, %s563_s25  ;;  %p567_p9 = scmp.lt.u32.totalorder %s563_s25, %s730_s1 }
  0x16   :  { %p569_p10 = pnand %p567_p9, %p564_p8 }
  0x18   :  { %572 = shalt.err (!%p569_p10)
}
  0x19   :  { %s573_s30 = scalar_lea.vmem %s639_s12, 256  ;;  %p578_p12 = scmp.lt.s32.totalorder %s639_s12, %s639_s12 }
  0x1a   :  { %p574_p11 = scmp.ne.s32.totalorder %s639_s12, %s573_s30  ;;  %p579_p13 = scmp.lt.s32.totalorder %s573_s30, %s573_s30 }
  0x1c   :  { %p580_p0 = por %p579_p13, %p578_p12 }
  0x1e   :  { %p581_p1 = pnand %p580_p0, %p574_p11 }
  0x20   :  { %584 = shalt.err (!%p581_p1)
}
  0x21   :  { %s615_s0 = smov 128   ;;  %s616_s3 = smov 8  }
  0x22   :  { %31 = dma.hbm_to_vmem [thread:$0]  %s730_s1, 256, %s639_s12, [#allocation6], %s615_s0, %s615_s0, %s616_s3  }
  0x23   :  { %607 = dma.done.wait [#allocation3], 64  }
  0x24   :  { %608 = vsyncadd [#allocation3], 4294967232 }
  0x25   :  { %609 = dma.done.wait [#allocation6], 256  }
  0x26   :  { %610 = vsyncadd [#allocation6], 4294967040  ;;  %vm334_vm0 = vcmask 130048   ;;  %v38_v0 = vld [vmem:[#allocation2] sm:$0xf]  ;;  %v332_v1 = vld [vmem:[#allocation5] sm:$0xff] }
  0x27   :  { %535 = vtanh.f32 %v38_v0  ;;  %513 = vmatprep.mubr.msk.f32.mxu0 %vm334_vm0, %v332_v1  ;;  %v617_v15 = vmov 683565275   ;;  %v618_v17 = vmov 2475754826   ;;  %v619_v19 = vmov 2131351028  }
  0x28   :  { %v620_v21 = vmov 2102212464   ;;  %v621_v23 = vmov 920167782   ;;  %v622_v30 = vmov 1326507024  }
  0x29   :  { %s623_s1 = smov [#allocation7]  }
  0x2a   :  { %s485_s6 = sshll.u32 %s623_s1, 4  ;;  %s486_s6 = int_to_ptr.vmem [resolvable:$true] %s485_s6 }
  0x2b   :  { %s585_s7 = scalar_lea.vmem %s486_s6, 64  ;;  %p590_p3 = scmp.lt.s32.totalorder %s486_s6, %s486_s6 }
  0x2c   :  { %p586_p2 = scmp.ne.s32.totalorder %s486_s6, %s585_s7  ;;  %p591_p4 = scmp.lt.s32.totalorder %s585_s7, %s585_s7 }
  0x2e   :  { %p592_p5 = por %p591_p4, %p590_p3 }
  0x30   :  { %p593_p6 = pnand %p592_p5, %p586_p2 }
  0x31   :  { %v536_v2 = vpop.eup %535 }
  0x32   :  { %v671_v3 = vmul.f32 0.7853982, %v536_v2 }
  0x34   :  { %v44_v4 = vand.u32 2139095040, %v671_v3  ;;  %v41_v6 = vand.u32 2147483647, %v671_v3  ;;  %vm43_vm8 = vcmp.lt.s32.totalorder %v671_v3, 0 }
  0x36   :  { %v45_v5 = vshrl.u32 %v44_v4, 23  ;;  %v48_v9 = vand.u32 8388607, %v41_v6  ;;  %vm42_vm9 = vcmp.le.f32.partialorder %v41_v6, 0.7853982 }
  0x38   :  { %v495_v7 = vadd.s32 4294967169, %v45_v5  ;;  %v49_v12 = vor.u32 8388608, %v48_v9 }
  0x3a   :  { %v51_v8 = vadd.s32 1, %v495_v7  ;;  %v89_v32 = vshll.u32 %v49_v12, 8 }
  0x3c   :  { %vm52_vm1 = vcmp.gt.s32.totalorder %v51_v8, 0 }
  0x3d   :  { %v53_v10 = vsel %vm52_vm1, %v51_v8, 0  ;;  %vm133_vm1 = vweird.f32 %v671_v3 }
  0x3e   :  { %v55_v11 = vand.u32 31, %v53_v10  ;;  %v54_v13 = vshrl.u32 %v53_v10, 5 }
  0x40   :  { %v56_v14 = vsub.s32 32, %v55_v11  ;;  %v58_v16 = vshll.u32 %v617_v15, %v55_v11  ;;  %v61_v18 = vshll.u32 %v618_v17, %v55_v11  ;;  %v64_v20 = vshll.u32 %v619_v19, %v55_v11 }
  0x41   :  { %v67_v22 = vshll.u32 %v620_v21, %v55_v11  ;;  %v70_v24 = vshll.u32 %v621_v23, %v55_v11  ;;  %vm73_vm2 = vcmp.lt.s32.totalorder %v54_v13, 1  ;;  %vm76_vm3 = vcmp.lt.s32.totalorder %v54_v13, 4 }
  0x42   :  { %v57_v25 = vshrl.u32 %v617_v15, %v56_v14  ;;  %v59_v26 = vshrl.u32 %v618_v17, %v56_v14  ;;  %v62_v27 = vshrl.u32 %v619_v19, %v56_v14  ;;  %v65_v28 = vshrl.u32 %v620_v21, %v56_v14 }
  0x43   :  { %v68_v29 = vshrl.u32 %v621_v23, %v56_v14  ;;  %v71_v31 = vshrl.u32 %v622_v30, %v56_v14  ;;  %vm74_vm4 = vcmp.lt.s32.totalorder %v54_v13, 2  ;;  %vm75_vm5 = vcmp.lt.s32.totalorder %v54_v13, 3 }
  0x44   :  { %v60_v33 = vor.u32 %v59_v26, %v58_v16  ;;  %v63_v34 = vor.u32 %v62_v27, %v61_v18  ;;  %v66_v35 = vor.u32 %v65_v28, %v64_v20  ;;  %v252_v23 = vlaneseq }
  0x45   :  { %v69_v36 = vor.u32 %v68_v29, %v67_v22  ;;  %v72_v37 = vor.u32 %v71_v31, %v70_v24 }
  0x46   :  { %v77_v38 = vsel %vm73_vm2, %v57_v25, %v60_v33  ;;  %v78_v39 = vsel %vm76_vm3, %v66_v35, 2102212464  ;;  %v81_v40 = vsel %vm73_vm2, %v60_v33, %v63_v34  ;;  %v85_v41 = vsel %vm73_vm2, %v63_v34, %v66_v35 }
  0x47   :  { %v79_v42 = vsel %vm75_vm5, %v63_v34, %v78_v39  ;;  %v82_v43 = vsel %vm76_vm3, %v69_v36, 920167782  ;;  %v86_v44 = vsel %vm76_vm3, %v72_v37, 1326507024  ;;  %v691_v25 = vshrl.u32 %v252_v23, 7 }
  0x48   :  { %v83_v45 = vsel %vm75_vm5, %v66_v35, %v82_v43  ;;  %v87_v46 = vsel %vm75_vm5, %v69_v36, %v86_v44  ;;  %v80_v47 = vsel %vm74_vm4, %v77_v38, %v79_v42 }
  0x49   :  { %v84_v48 = vsel %vm74_vm4, %v81_v40, %v83_v45  ;;  %v88_v49 = vsel %vm74_vm4, %v85_v41, %v87_v46  ;;  %v96_v54 = vmul.u32 %v89_v32, %v80_v47  ;;  %v254_v28 = vadd.s32 8, %v691_v25 }
  0x4a   :  { %v677_v50 = vmul.u32.u64.low %v89_v32, %v88_v49  ;;  %v678_v51 = vmul.u32.u64.high %v89_v32, %v88_v49, %v677_v50  ;;  %v680_v52 = vmul.u32.u64.low %v89_v32, %v84_v48  ;;  %v681_v53 = vmul.u32.u64.high %v89_v32, %v84_v48, %v680_v52 }
  0x4b   :  { %v255_v6 = vshra.s32 %v691_v25, 3  ;;  %v274_v30 = vshra.s32 %v691_v25, 2  ;;  %v294_v33 = vshra.s32 %v691_v25, 1  ;;  %v256_v35 = vshra.s32 %v254_v28, 3 }
  0x4c   :  { %vm98_vm6 = vc.u32 %v678_v51, %v680_v52  ;;  %v99_v55 = vadd.s32 1, %v681_v53  ;;  %v97_v2 = vadd.s32 %v680_v52, %v678_v51  ;;  %v275_v38 = vshra.s32 %v254_v28, 2 }
  0x4d   :  { %v295_v41 = vshra.s32 %v254_v28, 1  ;;  %v698_v44 = vand.u32 1, %v255_v6  ;;  %v314_v45 = vand.u32 1, %v691_v25  ;;  %v701_v48 = vand.u32 1, %v274_v30 }
  0x4e   :  { %v100_v56 = vsel %vm98_vm6, %v99_v55, %v681_v53  ;;  %v703_v49 = vand.u32 1, %v294_v33  ;;  %v258_v51 = vand.u32 1, %v256_v35  ;;  %v277_v52 = vand.u32 1, %v275_v38 }
  0x4f   :  { %v101_v57 = vadd.s32 %v100_v56, %v96_v54  ;;  %v264_v53 = vsub.s32 0, %v691_v25  ;;  %v282_v54 = vsub.s32 1, %v691_v25  ;;  %v297_v55 = vand.u32 1, %v295_v41 }
  0x50   :  { %v315_v56 = vand.u32 1, %v254_v28  ;;  %vm446_vm2 = vcmp.eq.s32.totalorder %v691_v25, 1  ;;  %vm461_vm3 = vcmp.eq.s32.totalorder %v691_v25, 2  ;;  %vm476_vm4 = vcmp.eq.s32.totalorder %v691_v25, 3 }
  0x51   :  { %v102_v58 = vadd.s32 536870912, %v101_v57 }
  0x53   :  { %v103_v59 = vshrl.u32 %v102_v58, 30 }
  0x55   :  { %v104_v60 = vshll.u32 %v103_v59, 30  ;;  %v127_v16 = vsub.s32 4, %v103_v59 }
  0x57   :  { %v105_v61 = vsub.s32 %v101_v57, %v104_v60  ;;  %v128_v19 = vsel %vm43_vm8, %v127_v16, %v103_v59  ;;  %v302_v59 = vsub.s32 2, %v691_v25  ;;  %v320_v60 = vsub.s32 3, %v691_v25 }
  0x58   :  { %v130_v22 = vsel %vm42_vm9, 0, %v128_v19 }
  0x59   :  { %v107_v62 = vsub.s32 0, %v105_v61  ;;  %v237_v24 = vadd.s32 3, %v130_v22  ;;  %v134_v26 = vand.u32 3, %v130_v22 }
  0x5b   :  { %v496_v63 = vmin.u32 %v107_v62, %v105_v61  ;;  %v238_v27 = vand.u32 3, %v237_v24  ;;  %vm139_vm10 = vcmp.eq.s32.totalorder %v134_v26, 2  ;;  %vm136_vm12 = vcmp.eq.s32.totalorder %v134_v26, 0 }
  0x5c   :  { %vm135_vm14 = vcmp.lt.s32.totalorder %v134_v26, 2  ;;  %v278_v62 = vcvt.s32.f32 %v701_v48 }
  0x5d   :  { %v109_v0 = vclz %v496_v63  ;;  %vm243_vm11 = vcmp.eq.s32.totalorder %v238_v27, 2  ;;  %vm240_vm13 = vcmp.eq.s32.totalorder %v238_v27, 0  ;;  %vm239_vm15 = vcmp.lt.s32.totalorder %v238_v27, 2 }
  0x5e   :  { %v316_v63 = vcvt.s32.f32 %v314_v45  ;;  %v433_v45 = vmul.f32 2.0, %v278_v62 }
  0x5f   :  { %v497_v1 = vadd.s32 4294967294, %v109_v0  ;;  %v260_v0 = vcvt.s32.f32 %v258_v51 }
  0x61   :  { %vm498_vm7 = vcmp.lt.s32.totalorder %v497_v1, 0 }
  0x62   :  { %v112_v4 = vsel %vm498_vm7, 0, %v497_v1 }
  0x63   :  { %v113_v5 = vsub.s32 32, %v112_v4  ;;  %v114_v7 = vshll.u32 %v105_v61, %v112_v4  ;;  %v117_v8 = vsub.s32 4294967266, %v112_v4  ;;  %v259_v61 = vcvt.s32.f32 %v698_v44 }
  0x64   :  { %v298_v4 = vcvt.s32.f32 %v703_v49 }
  0x65   :  { %v115_v9 = vshrl.u32 %v97_v2, %v113_v5  ;;  %v118_v10 = vadd.s32 127, %v117_v8  ;;  %v279_v2 = vcvt.s32.f32 %v277_v52  ;;  %v299_v8 = vcvt.s32.f32 %v297_v55 }
  0x66   :  { %v418_v44 = vmul.f32 2.0, %v259_v61 }
  0x67   :  { %v116_v11 = vor.u32 %v115_v9, %v114_v7  ;;  %v119_v12 = vshll.u32 %v118_v10, 23  ;;  %v317_v9 = vcvt.s32.f32 %v315_v56  ;;  %v434_v41 = vmul.f32 2.0, %v279_v2 }
  0x68   :  { %v420_v52 = vsub.f32 1.0, %v418_v44 }
  0x69   :  { %v120_v13 = vor.u32 4788187, %v119_v12  ;;  %v123_v14 = vcvt.s32.f32 %v116_v11  ;;  %v436_v49 = vsub.f32 1.0, %v434_v41 }
  0x6b   :  { %v121_v15 = vand.u32 2147483647, %v120_v13 }
  0x6d   :  { %v124_v17 = vmul.f32 %v123_v14, %v121_v15 }
  0x6f   :  { %v125_v18 = vxor.u32 2147483648, %v124_v17 }
  0x71   :  { %v126_v20 = vsel %vm43_vm8, %v125_v18, %v124_v17 }
  0x72   :  { %v129_v21 = vsel %vm42_vm9, %v671_v3, %v126_v20 }
  0x73   :  { %537 = vcosq.f32 %v129_v21 }
  0x74   :  { %539 = vsinq.f32 %v129_v21 }
  0x7d   :  { %v538_v29 = vpop.eup %537 }
  0x7e   :  { %v540_v31 = vpop.eup %539  ;;  %v140_v32 = vxor.u32 2147483648, %v538_v29 }
  0x7f   :  { %v137_v34 = vxor.u32 2147483648, %v540_v31 }
  0x80   :  { %v141_v36 = vsel %vm139_vm10, %v140_v32, %v540_v31  ;;  %v245_v37 = vsel %vm243_vm11, %v140_v32, %v540_v31 }
  0x81   :  { %v138_v39 = vsel %vm136_vm12, %v538_v29, %v137_v34  ;;  %v242_v40 = vsel %vm240_vm13, %v538_v29, %v137_v34 }
  0x82   :  { %v142_v42 = vsel %vm135_vm14, %v138_v39, %v141_v36  ;;  %v246_v43 = vsel %vm239_vm15, %v242_v40, %v245_v37  ;;  %v333_v39 = vld [vmem:[#allocation5 + $0x8] sm:$0xff]  ;;  %v419_v40 = vmul.f32 2.0, %v260_v0 }
  0x83   :  { %v143_v46 = vsel %vm133_vm1, nan, %v142_v42  ;;  %v247_v47 = vsel %vm133_vm1, nan, %v246_v43  ;;  %v449_v42 = vmul.f32 2.0, %v299_v8  ;;  %v464_v43 = vmul.f32 2.0, %v317_v9 }
  0x84   :  { %v248_v50 = vsub.f32 %v143_v46, %v247_v47  ;;  %v250_v3 = vadd.f32 %v247_v47, %v143_v46  ;;  %v448_v46 = vmul.f32 2.0, %v298_v4  ;;  %v463_v47 = vmul.f32 2.0, %v316_v63 }
  0x85   :  { %v421_v48 = vsub.f32 1.0, %v419_v40 }
  0x86   :  { %v249_v57 = vmul.f32 0.70710677, %v248_v50  ;;  %v251_v58 = vmul.f32 0.70710677, %v250_v3  ;;  %v451_v50 = vsub.f32 1.0, %v449_v42  ;;  %v466_v3 = vsub.f32 1.0, %v464_v43 }
  0x87   :  { %v465_v55 = vsub.f32 1.0, %v463_v47 }
  0x88   :  { %v261_v1 = vsub.f32 %v251_v58, %v249_v57  ;;  %v271_v5 = vrot.slane %v249_v57, %v264_v53  ;;  %v289_v7 = vrot.slane %v249_v57, %v282_v54  ;;  %v309_v14 = vrot.slane %v249_v57, %v302_v59 }
  0x89   :  { %v327_v15 = vrot.slane %v249_v57, %v320_v60 }
  0x8a   :  { %v265_v10 = vrot.slane %v261_v1, %v264_v53  ;;  %v283_v11 = vrot.slane %v261_v1, %v282_v54  ;;  %v303_v12 = vrot.slane %v261_v1, %v302_v59  ;;  %v321_v13 = vrot.slane %v261_v1, %v320_v60 }
  0x8b   :  { %v435_v53 = vsub.f32 1.0, %v433_v45  ;;  %v450_v54 = vsub.f32 1.0, %v448_v46 }
  0x8c   :  { %v266_v16 = vmul.f32 %v265_v10, %v259_v61  ;;  %v267_v17 = vmul.f32 %v265_v10, %v260_v0  ;;  %v284_v18 = vmul.f32 %v283_v11, %v278_v62  ;;  %v285_v19 = vmul.f32 %v283_v11, %v279_v2 }
  0x8d   :  { %v304_v20 = vmul.f32 %v303_v12, %v298_v4  ;;  %v305_v21 = vmul.f32 %v303_v12, %v299_v8  ;;  %v322_v22 = vmul.f32 %v321_v13, %v316_v63  ;;  %v323_v23 = vmul.f32 %v321_v13, %v317_v9 }
  0x8e   :  { %v272_v24 = vadd.f32 %v271_v5, %v266_v16  ;;  %v273_v26 = vadd.f32 %v271_v5, %v267_v17  ;;  %v290_v27 = vadd.f32 %v289_v7, %v284_v18  ;;  %v291_v28 = vadd.f32 %v289_v7, %v285_v19 }
  0x8f   :  { %v310_v29 = vadd.f32 %v309_v14, %v304_v20  ;;  %v311_v6 = vadd.f32 %v309_v14, %v305_v21  ;;  %v328_v32 = vadd.f32 %v327_v15, %v322_v22  ;;  %v329_v33 = vadd.f32 %v327_v15, %v323_v23 }
  0x90   :  { %v292_v30 = vmul.f32 %v290_v27, %v272_v24  ;;  %v293_v31 = vmul.f32 %v291_v28, %v273_v26 }
  0x92   :  { %v312_v34 = vmul.f32 %v310_v29, %v292_v30  ;;  %v313_v35 = vmul.f32 %v311_v6, %v293_v31 }
  0x94   :  { %v330_v36 = vmul.f32 %v328_v32, %v312_v34  ;;  %v331_v37 = vmul.f32 %v329_v33, %v313_v35 }
  0x96   :  { %v516_v38 = vpack.c.bf16 %v331_v37, %v330_v36 }
  0x98   :  { %517 = vmatprep.subr.bf16.mxu0 %v516_v38 }
  0x99   :  { %519 = vmatpush3.bf16.msra.mxu0 %v516_v38 }
  0x9c   :  { %514 = vmatmul.mubr.msk.f32.vlgmr.msra.gmra.mrb[0].mxu0 %vm334_vm0, %v333_v39  ;;  %vm431_vm0 = vcmp.eq.s32.totalorder %v691_v25, 0 }
 0x16f   :  { %v515_v51 = vpop.f32.mrb[0].mxu0 }
 0x170   :  { %v417_v56 = vmul.f32 %v515_v51, %v515_v51  ;;  %v407_v57 = vpop.f32.mrb[1].mxu0 }
 0x171   :  { %v416_v58 = vmul.f32 %v407_v57, %v407_v57 }
 0x172   :  { %v423_v59 = vmul.f32 %v421_v48, %v417_v56  ;;  %v438_v60 = vmul.f32 %v436_v49, %v417_v56  ;;  %v453_v0 = vmul.f32 %v451_v50, %v417_v56  ;;  %v468_v1 = vmul.f32 %v466_v3, %v417_v56 }
 0x173   :  { %v422_v61 = vmul.f32 %v420_v52, %v416_v58  ;;  %v437_v62 = vmul.f32 %v435_v53, %v416_v58  ;;  %v452_v2 = vmul.f32 %v450_v54, %v416_v58  ;;  %v467_v63 = vmul.f32 %v465_v55, %v416_v58 }
 0x175   :  { %v424_v4 = vadd.f32 %v423_v59, %v422_v61  ;;  %v439_v5 = vadd.f32 %v438_v60, %v437_v62  ;;  %v454_v7 = vadd.f32 %v453_v0, %v452_v2  ;;  %v469_v8 = vadd.f32 %v468_v1, %v467_v63 }
 0x177   :  { %v425_v9 = vrot.slane %v424_v4, 4  ;;  %v440_v10 = vrot.slane %v439_v5, 4  ;;  %v455_v11 = vrot.slane %v454_v7, 4  ;;  %v470_v12 = vrot.slane %v469_v8, 4 }
 0x179   :  { %v426_v13 = vadd.f32 %v425_v9, %v424_v4  ;;  %v441_v14 = vadd.f32 %v440_v10, %v439_v5  ;;  %v456_v15 = vadd.f32 %v455_v11, %v454_v7  ;;  %v471_v16 = vadd.f32 %v470_v12, %v469_v8 }
 0x17b   :  { %v427_v17 = vrot.slane %v426_v13, 2  ;;  %v442_v18 = vrot.slane %v441_v14, 2  ;;  %v457_v19 = vrot.slane %v456_v15, 2  ;;  %v472_v20 = vrot.slane %v471_v16, 2 }
 0x17d   :  { %v428_v21 = vadd.f32 %v427_v17, %v426_v13  ;;  %v443_v22 = vadd.f32 %v442_v18, %v441_v14  ;;  %v458_v23 = vadd.f32 %v457_v19, %v456_v15  ;;  %v473_v24 = vadd.f32 %v472_v20, %v471_v16 }
 0x17f   :  { %v429_v26 = vrot.slane %v428_v21, 1  ;;  %v444_v27 = vrot.slane %v443_v22, 1  ;;  %v459_v28 = vrot.slane %v458_v23, 1  ;;  %v474_v29 = vrot.slane %v473_v24, 1 }
 0x181   :  { %v430_v6 = vadd.f32 %v429_v26, %v428_v21  ;;  %v445_v30 = vadd.f32 %v444_v27, %v443_v22  ;;  %v460_v32 = vadd.f32 %v459_v28, %v458_v23  ;;  %v475_v34 = vadd.f32 %v474_v29, %v473_v24 }
 0x183   :  { %v432_v31 = vsel %vm431_vm0, %v430_v6, 0.0 }
 0x184   :  { %v447_v33 = vsel %vm446_vm2, %v445_v30, %v432_v31 }
 0x185   :  { %v462_v35 = vsel %vm461_vm3, %v460_v32, %v447_v33 }
 0x186   :  { %v477_v36 = vsel %vm476_vm4, %v475_v34, %v462_v35 }
 0x187   :  { %478 = vst [vmem:[#allocation7] sm:$0xf] %v477_v36 }
 0x188   :  { %596 = shalt.err (!%p593_p6)
}
 0x189   :  { %s597_s10 = scalar_lea.hbm %s731_s2, 64 }
 0x18a   :  { %p598_p7 = scmp.ne.s32.totalorder %s731_s2, %s597_s10  ;;  %p601_p8 = scmp.lt.u32.totalorder %s597_s10, %s731_s2 }
 0x18c   :  { %p603_p9 = pnand %p601_p8, %p598_p7 }
 0x18e   :  { %606 = shalt.err (!%p603_p9)
}
 0x18f   :  { %488 = dma.vmem_to_hbm [thread:$0]  %s486_s6, 64, %s731_s2, [#allocation4]  }
 0x190   :  { %611 = dma.done.wait [#allocation4], 64  }
 0x191   :  { %612 = vsyncadd [#allocation4], 4294967232 }
 0x192   :  { %492 = vsyncpa [#allocation3], 1 }
 0x193   :  { %493 = vsyncpa [#allocation6], 1 }
 0x194   :  { %494 = vsyncpa [#allocation4], 1 }

</bundles_post_ra>
